<compile_context>
chip_gen: v6e
topology: v6e:2x2x1
jax: 0.10.0
libtpu: 0.0.40
codegen_flags: <defaults>
</compile_context>

<pallas_src>
import functools

import jax
import jax.numpy as jnp
from jax.experimental import pallas as pl
from jax.experimental.pallas import tpu as pltpu


def _lane_mod(idx, m):
    """idx % m for an i32 lane vector with a *static* modulus."""
    if m & (m - 1) == 0:                       # power of two -> bit mask (always lowers)
        return jnp.bitwise_and(idx, m - 1)
    return jax.lax.rem(idx, jnp.int32(m))      # general fallback


def _resblock_kernel(x_ref, w1_ref, b1_ref, w2_ref, b2_ref, o_ref, slab_ref,
                     *, H, W, K, HW, res_scale, compute_dtype):
    """Fused ResBlock over a block of whole images laid out on lanes.

    x_ref   : (C, L)            L = images_per_block * H * W (lane-dense)
    w*_ref  : (C, K*K*C)        im2col weights [cout, tap*Cin + cin] (compute_dtype)
    b*_ref  : (C, 1)            biases (f32)
    o_ref   : (C, L)            output
    slab_ref: (K*K*C, L) f32    scratch im2col slab (shifted + border-masked taps)
    """
    p = K // 2
    C, L = x_ref.shape
    x2d = x_ref[...].astype(jnp.float32)                      # residual kept in f32

    # Border masks generated in-kernel from lane indices (no mask DMA).
    idx = jax.lax.broadcasted_iota(jnp.int32, (1, L), 1)
    local = _lane_mod(idx, HW)                                 # flat index within image
    col = _lane_mod(idx, W)                                    # column within image row

    def conv(src, w_ref_, b_ref_):
        # Build the (K*K*C, L) im2col slab: one lane-rolled, masked copy per tap.
        for kh in range(K):
            for kw in range(K):
                dh, dw = kh - p, kw - p
                t = kh * K + kw
                s = dh * W + dw                                # flattened spatial shift
                shifted = src if s == 0 else pltpu.roll(src, shift=(-s) % L, axis=1)
                conds = []
                if dh < 0:
                    conds.append(local >= (-dh) * W)
                if dh > 0:
                    conds.append(local < (H - dh) * W)
                if dw < 0:
                    conds.append(col >= -dw)
                if dw > 0:
                    conds.append(col < W - dw)
                if conds:
                    valid = conds[0]
                    for c in conds[1:]:
                        valid = jnp.logical_and(valid, c)
                    tap = jnp.where(valid, shifted, 0.0)       # zero out-of-image reads
                else:
                    tap = shifted                              # center tap
                slab_ref[t * C:(t + 1) * C, :] = tap
        # One MXU dot per conv, bf16 operands, f32 accumulation.
        acc = jnp.dot(w_ref_[...], slab_ref[...].astype(compute_dtype),
                      preferred_element_type=jnp.float32)
        return acc + b_ref_[...]

    h = jnp.maximum(conv(x2d, w1_ref, b1_ref), 0.0)            # conv1 + ReLU (on-chip)
    y = conv(h, w2_ref, b2_ref)                                # conv2
    if res_scale != 1.0:
        y = y * res_scale
    o_ref[...] = (y + x2d).astype(o_ref.dtype)                 # single lane-dense store


def _pick_imgs_per_block(N, HW):
    """Whole images per lane block. Prefer >=2 blocks (v7x has 2 TensorCores) with a
    128-aligned lane width (keeps the single unmasked vst path on v5e); cap the block
    width so the (K*K*C, L) slab stays small in VMEM. Fallback: one full-batch block."""
    max_lanes = 8 * 1024
    best = N
    for d in range(1, N + 1):
        if N % d or d * HW > max_lanes:
            continue
        if N // d >= 2 and (d * HW) % 128 == 0:
            best = d                       # largest width that still leaves >=2 blocks
    return best


def res_block_forward(x_nchw, w1_oihw, b1, w2_oihw, b2, res_scale=1.0,
                      *, compute_dtype=jnp.bfloat16):
    """ResBlock forward. x_nchw: (N, C, H, W); weights in PyTorch OIHW layout."""
    N, C, H, W = x_nchw.shape
    Cout, Cin, K, K2 = w1_oihw.shape
    assert K == K2 and K % 2 == 1, "only odd kernel sizes (SAME padding) supported"
    assert Cout == C and Cin == C and w2_oihw.shape == (C, C, K, K)
    HW = H * W

    imgs = _pick_imgs_per_block(N, HW)
    n_blocks = N // imgs
    Lb = imgs * HW

    # Batch on lanes: (N, C, H, W) -> (C, N*H*W). Circular rolls that cross image
    # boundaries only land on lanes the per-image border masks zero out.
    x_cl = jnp.transpose(x_nchw.reshape(N, C, HW), (1, 0, 2)).reshape(C, N * HW)

    # OIHW -> im2col layout (Cout, K*K*Cin); cast to the MXU compute dtype.
    w1_f = jnp.transpose(w1_oihw, (0, 2, 3, 1)).reshape(C, K * K * C).astype(compute_dtype)
    w2_f = jnp.transpose(w2_oihw, (0, 2, 3, 1)).reshape(C, K * K * C).astype(compute_dtype)
    b1_c = b1.reshape(C, 1).astype(jnp.float32)
    b2_c = b2.reshape(C, 1).astype(jnp.float32)

    kern = functools.partial(_resblock_kernel, H=H, W=W, K=K, HW=HW,
                             res_scale=float(res_scale), compute_dtype=compute_dtype)

    out_cl = pl.pallas_call(
        kern,
        out_shape=jax.ShapeDtypeStruct((C, N * HW), x_nchw.dtype),
        grid=(n_blocks,),
        in_specs=[
            pl.BlockSpec((C, Lb), lambda g: (0, g)),            # x  (lane-dense)
            pl.BlockSpec((C, K * K * C), lambda g: (0, 0)),     # w1 (im2col slab)
            pl.BlockSpec((C, 1), lambda g: (0, 0)),             # b1
            pl.BlockSpec((C, K * K * C), lambda g: (0, 0)),     # w2
            pl.BlockSpec((C, 1), lambda g: (0, 0)),             # b2
        ],
        out_specs=pl.BlockSpec((C, Lb), lambda g: (0, g)),
        scratch_shapes=[pltpu.VMEM((K * K * C, Lb), jnp.float32)],
        compiler_params=pltpu.CompilerParams(dimension_semantics=("parallel",)),
    )(x_cl, w1_f, b1_c, w2_f, b2_c)
    # TODO(synk): production EDSR sizes (n_feats>=64, large H*W) need a row-tiled grid
    # axis with K-1 halo rows per tile (the circular roll is only valid over whole
    # images) and a TILE_H budgeted against v7x's 64 MiB VMEM (set vmem_limit_bytes).
    return jnp.transpose(out_cl.reshape(C, N, H, W), (1, 0, 2, 3))


def _ref_forward(x_nchw, w1_oihw, b1, w2_oihw, b2, res_scale=1.0,
                 compute_dtype=jnp.bfloat16):
    """Pure-JAX reference with matched precision (bf16 conv operands, f32 accumulate)."""
    dn = jax.lax.conv_dimension_numbers(x_nchw.shape, w1_oihw.shape,
                                        ('NCHW', 'OIHW', 'NCHW'))

    def conv(inp, w):
        return jax.lax.conv_general_dilated(
            inp.astype(compute_dtype), w.astype(compute_dtype), (1, 1), 'SAME',
            dimension_numbers=dn, preferred_element_type=jnp.float32)

    h = jnp.maximum(conv(x_nchw, w1_oihw) + b1[None, :, None, None], 0.0)
    y = conv(h, w2_oihw) + b2[None, :, None, None]
    return y * res_scale + x_nchw.astype(jnp.float32)


if __name__ == "__main__":
    n_feats, K = 4, 3
    N, H, W = 2, 16, 16
    res_scale = 1.0

    key = jax.random.PRNGKey(0)
    k_x, k_w1, k_b1, k_w2, k_b2 = jax.random.split(key, 5)

    # Deterministic params in native PyTorch Conv2d layout (Cout, Cin, K, K).
    fan_in = n_feats * K * K
    bound = 1.0 / (fan_in ** 0.5)
    w1 = jax.random.uniform(k_w1, (n_feats, n_feats, K, K), jnp.float32, -bound, bound)
    w2 = jax.random.uniform(k_w2, (n_feats, n_feats, K, K), jnp.float32, -bound, bound)
    b1 = jax.random.uniform(k_b1, (n_feats,), jnp.float32, -bound, bound)
    b2 = jax.random.uniform(k_b2, (n_feats,), jnp.float32, -bound, bound)
    x = jax.random.normal(k_x, (N, n_feats, H, W), jnp.float32)   # NCHW like PyTorch

    out = jax.block_until_ready(res_block_forward(x, w1, b1, w2, b2, res_scale))
    ref = jax.block_until_ready(_ref_forward(x, w1, b1, w2, b2, res_scale))

    assert out.shape == x.shape and out.dtype == x.dtype
    max_err = float(jnp.max(jnp.abs(out - ref)))
    # bf16 MXU operands in both kernel and reference; residual differences come only
    # from f32 accumulation order (rare bf16 rounding flips of the hidden activation).
    assert jnp.allclose(out, ref, atol=1e-2, rtol=1e-2), max_err
    print("KERNEL_OK")
</pallas_src>

<mosaic_0001>
module attributes {stable_mosaic.version = 11 : i64} {
  func.func @_resblock_kernel(%arg0: i32, %arg1: memref<4x256xf32, #tpu.memory_space<vmem>>, %arg2: memref<4x36xbf16, #tpu.memory_space<vmem>>, %arg3: memref<4x1xf32, #tpu.memory_space<vmem>>, %arg4: memref<4x36xbf16, #tpu.memory_space<vmem>>, %arg5: memref<4x1xf32, #tpu.memory_space<vmem>>, %arg6: memref<4x256xf32, #tpu.memory_space<vmem>>, %arg7: memref<36x256xf32, #tpu.memory_space<vmem>>) attributes {dimension_semantics = [#tpu.dimension_semantics<parallel>], iteration_bounds = array<i64: 2>, scalar_prefetch = 0 : i64, scratch_operands = 1 : i64, tpu.core_type = #tpu.core_type<tc>, window_params = [{transform_indices = @transform_0, window_bounds = array<i64: 4, 256>}, {pipeline_mode = #tpu.pipeline_mode<synchronous>, transform_indices = @transform_1, window_bounds = array<i64: 4, 36>}, {pipeline_mode = #tpu.pipeline_mode<synchronous>, transform_indices = @transform_2, window_bounds = array<i64: 4, 1>}, {pipeline_mode = #tpu.pipeline_mode<synchronous>, transform_indices = @transform_3, window_bounds = array<i64: 4, 36>}, {pipeline_mode = #tpu.pipeline_mode<synchronous>, transform_indices = @transform_4, window_bounds = array<i64: 4, 1>}, {transform_indices = @transform_5, window_bounds = array<i64: 4, 256>}]} {
    %c0 = arith.constant 0 : index
    %c0_0 = arith.constant 0 : index
    %0 = vector.load %arg1[%c0, %c0_0] : memref<4x256xf32, #tpu.memory_space<vmem>>, vector<4x256xf32>
    %1 = tpu.iota {dimensions = array<i32: 1>} : vector<1x256xi32>
    %c255_i32 = arith.constant 255 : i32
    %2 = vector.broadcast %c255_i32 : i32 to vector<1x256xi32>
    %3 = arith.andi %1, %2 : vector<1x256xi32>
    %c15_i32 = arith.constant 15 : i32
    %4 = vector.broadcast %c15_i32 : i32 to vector<1x256xi32>
    %5 = arith.andi %1, %4 : vector<1x256xi32>
    %c17_i32 = arith.constant 17 : i32
    %6 = tpu.dynamic_rotate %0 by %c17_i32 dim 1 : vector<4x256xf32>, i32 -> vector<4x256xf32>
    %c16_i32 = arith.constant 16 : i32
    %7 = vector.broadcast %c16_i32 : i32 to vector<1x256xi32>
    %8 = arith.cmpi sge, %3, %7 : vector<1x256xi32>
    %c1_i32 = arith.constant 1 : i32
    %9 = vector.broadcast %c1_i32 : i32 to vector<1x256xi32>
    %10 = arith.cmpi sge, %5, %9 : vector<1x256xi32>
    %11 = arith.andi %8, %10 : vector<1x256xi1>
    %cst = arith.constant 0.000000e+00 : f32
    %12 = vector.shape_cast %11 : vector<1x256xi1> to vector<1x256xi1>
    %13 = vector.broadcast %12 : vector<1x256xi1> to vector<4x256xi1>
    %14 = vector.broadcast %cst : f32 to vector<4x256xf32>
    %15 = arith.select %13, %6, %14 : vector<4x256xi1>, vector<4x256xf32>
    %c0_1 = arith.constant 0 : index
    %c0_2 = arith.constant 0 : index
    %16 = vector.load %arg7[%c0_1, %c0_2] : memref<36x256xf32, #tpu.memory_space<vmem>>, vector<4x256xf32>
    tpu.vector_store %arg7[%c0_1, %c0_2], %15 {strides = array<i32>} : memref<36x256xf32, #tpu.memory_space<vmem>>, vector<4x256xf32>,
    %c16_i32_3 = arith.constant 16 : i32
    %17 = tpu.dynamic_rotate %0 by %c16_i32_3 dim 1 : vector<4x256xf32>, i32 -> vector<4x256xf32>
    %c16_i32_4 = arith.constant 16 : i32
    %18 = vector.broadcast %c16_i32_4 : i32 to vector<1x256xi32>
    %19 = arith.cmpi sge, %3, %18 : vector<1x256xi32>
    %cst_5 = arith.constant 0.000000e+00 : f32
    %20 = vector.shape_cast %19 : vector<1x256xi1> to vector<1x256xi1>
    %21 = vector.broadcast %20 : vector<1x256xi1> to vector<4x256xi1>
    %22 = vector.broadcast %cst_5 : f32 to vector<4x256xf32>
    %23 = arith.select %21, %17, %22 : vector<4x256xi1>, vector<4x256xf32>
    %c4 = arith.constant 4 : index
    %c0_6 = arith.constant 0 : index
    %24 = vector.load %arg7[%c4, %c0_6] : memref<36x256xf32, #tpu.memory_space<vmem>>, vector<4x256xf32>
    tpu.vector_store %arg7[%c4, %c0_6], %23 {strides = array<i32>} : memref<36x256xf32, #tpu.memory_space<vmem>>, vector<4x256xf32>,
    %c15_i32_7 = arith.constant 15 : i32
    %25 = tpu.dynamic_rotate %0 by %c15_i32_7 dim 1 : vector<4x256xf32>, i32 -> vector<4x256xf32>
    %c16_i32_8 = arith.constant 16 : i32
    %26 = vector.broadcast %c16_i32_8 : i32 to vector<1x256xi32>
    %27 = arith.cmpi sge, %3, %26 : vector<1x256xi32>
    %c15_i32_9 = arith.constant 15 : i32
    %28 = vector.broadcast %c15_i32_9 : i32 to vector<1x256xi32>
    %29 = arith.cmpi slt, %5, %28 : vector<1x256xi32>
    %30 = arith.andi %27, %29 : vector<1x256xi1>
    %cst_10 = arith.constant 0.000000e+00 : f32
    %31 = vector.shape_cast %30 : vector<1x256xi1> to vector<1x256xi1>
    %32 = vector.broadcast %31 : vector<1x256xi1> to vector<4x256xi1>
    %33 = vector.broadcast %cst_10 : f32 to vector<4x256xf32>
    %34 = arith.select %32, %25, %33 : vector<4x256xi1>, vector<4x256xf32>
    %c8 = arith.constant 8 : index
    %c0_11 = arith.constant 0 : index
    %35 = vector.load %arg7[%c8, %c0_11] : memref<36x256xf32, #tpu.memory_space<vmem>>, vector<4x256xf32>
    tpu.vector_store %arg7[%c8, %c0_11], %34 {strides = array<i32>} : memref<36x256xf32, #tpu.memory_space<vmem>>, vector<4x256xf32>,
    %c1_i32_12 = arith.constant 1 : i32
    %36 = tpu.dynamic_rotate %0 by %c1_i32_12 dim 1 : vector<4x256xf32>, i32 -> vector<4x256xf32>
    %c1_i32_13 = arith.constant 1 : i32
    %37 = vector.broadcast %c1_i32_13 : i32 to vector<1x256xi32>
    %38 = arith.cmpi sge, %5, %37 : vector<1x256xi32>
    %cst_14 = arith.constant 0.000000e+00 : f32
    %39 = vector.shape_cast %38 : vector<1x256xi1> to vector<1x256xi1>
    %40 = vector.broadcast %39 : vector<1x256xi1> to vector<4x256xi1>
    %41 = vector.broadcast %cst_14 : f32 to vector<4x256xf32>
    %42 = arith.select %40, %36, %41 : vector<4x256xi1>, vector<4x256xf32>
    %c12 = arith.constant 12 : index
    %c0_15 = arith.constant 0 : index
    %43 = vector.load %arg7[%c12, %c0_15] : memref<36x256xf32, #tpu.memory_space<vmem>>, vector<4x256xf32>
    tpu.vector_store %arg7[%c12, %c0_15], %42 {strides = array<i32>} : memref<36x256xf32, #tpu.memory_space<vmem>>, vector<4x256xf32>,
    %c16 = arith.constant 16 : index
    %c0_16 = arith.constant 0 : index
    %44 = vector.load %arg7[%c16, %c0_16] : memref<36x256xf32, #tpu.memory_space<vmem>>, vector<4x256xf32>
    tpu.vector_store %arg7[%c16, %c0_16], %0 {strides = array<i32>} : memref<36x256xf32, #tpu.memory_space<vmem>>, vector<4x256xf32>,
    %c255_i32_17 = arith.constant 255 : i32
    %45 = tpu.dynamic_rotate %0 by %c255_i32_17 dim 1 : vector<4x256xf32>, i32 -> vector<4x256xf32>
    %c15_i32_18 = arith.constant 15 : i32
    %46 = vector.broadcast %c15_i32_18 : i32 to vector<1x256xi32>
    %47 = arith.cmpi slt, %5, %46 : vector<1x256xi32>
    %cst_19 = arith.constant 0.000000e+00 : f32
    %48 = vector.shape_cast %47 : vector<1x256xi1> to vector<1x256xi1>
    %49 = vector.broadcast %48 : vector<1x256xi1> to vector<4x256xi1>
    %50 = vector.broadcast %cst_19 : f32 to vector<4x256xf32>
    %51 = arith.select %49, %45, %50 : vector<4x256xi1>, vector<4x256xf32>
    %c20 = arith.constant 20 : index
    %c0_20 = arith.constant 0 : index
    %52 = vector.load %arg7[%c20, %c0_20] : memref<36x256xf32, #tpu.memory_space<vmem>>, vector<4x256xf32>
    tpu.vector_store %arg7[%c20, %c0_20], %51 {strides = array<i32>} : memref<36x256xf32, #tpu.memory_space<vmem>>, vector<4x256xf32>,
    %c241_i32 = arith.constant 241 : i32
    %53 = tpu.dynamic_rotate %0 by %c241_i32 dim 1 : vector<4x256xf32>, i32 -> vector<4x256xf32>
    %c240_i32 = arith.constant 240 : i32
    %54 = vector.broadcast %c240_i32 : i32 to vector<1x256xi32>
    %55 = arith.cmpi slt, %3, %54 : vector<1x256xi32>
    %c1_i32_21 = arith.constant 1 : i32
    %56 = vector.broadcast %c1_i32_21 : i32 to vector<1x256xi32>
    %57 = arith.cmpi sge, %5, %56 : vector<1x256xi32>
    %58 = arith.andi %55, %57 : vector<1x256xi1>
    %cst_22 = arith.constant 0.000000e+00 : f32
    %59 = vector.shape_cast %58 : vector<1x256xi1> to vector<1x256xi1>
    %60 = vector.broadcast %59 : vector<1x256xi1> to vector<4x256xi1>
    %61 = vector.broadcast %cst_22 : f32 to vector<4x256xf32>
    %62 = arith.select %60, %53, %61 : vector<4x256xi1>, vector<4x256xf32>
    %c24 = arith.constant 24 : index
    %c0_23 = arith.constant 0 : index
    %63 = vector.load %arg7[%c24, %c0_23] : memref<36x256xf32, #tpu.memory_space<vmem>>, vector<4x256xf32>
    tpu.vector_store %arg7[%c24, %c0_23], %62 {strides = array<i32>} : memref<36x256xf32, #tpu.memory_space<vmem>>, vector<4x256xf32>,
    %c240_i32_24 = arith.constant 240 : i32
    %64 = tpu.dynamic_rotate %0 by %c240_i32_24 dim 1 : vector<4x256xf32>, i32 -> vector<4x256xf32>
    %c240_i32_25 = arith.constant 240 : i32
    %65 = vector.broadcast %c240_i32_25 : i32 to vector<1x256xi32>
    %66 = arith.cmpi slt, %3, %65 : vector<1x256xi32>
    %cst_26 = arith.constant 0.000000e+00 : f32
    %67 = vector.shape_cast %66 : vector<1x256xi1> to vector<1x256xi1>
    %68 = vector.broadcast %67 : vector<1x256xi1> to vector<4x256xi1>
    %69 = vector.broadcast %cst_26 : f32 to vector<4x256xf32>
    %70 = arith.select %68, %64, %69 : vector<4x256xi1>, vector<4x256xf32>
    %c28 = arith.constant 28 : index
    %c0_27 = arith.constant 0 : index
    %71 = vector.load %arg7[%c28, %c0_27] : memref<36x256xf32, #tpu.memory_space<vmem>>, vector<4x256xf32>
    tpu.vector_store %arg7[%c28, %c0_27], %70 {strides = array<i32>} : memref<36x256xf32, #tpu.memory_space<vmem>>, vector<4x256xf32>,
    %c239_i32 = arith.constant 239 : i32
    %72 = tpu.dynamic_rotate %0 by %c239_i32 dim 1 : vector<4x256xf32>, i32 -> vector<4x256xf32>
    %c240_i32_28 = arith.constant 240 : i32
    %73 = vector.broadcast %c240_i32_28 : i32 to vector<1x256xi32>
    %74 = arith.cmpi slt, %3, %73 : vector<1x256xi32>
    %c15_i32_29 = arith.constant 15 : i32
    %75 = vector.broadcast %c15_i32_29 : i32 to vector<1x256xi32>
    %76 = arith.cmpi slt, %5, %75 : vector<1x256xi32>
    %77 = arith.andi %74, %76 : vector<1x256xi1>
    %cst_30 = arith.constant 0.000000e+00 : f32
    %78 = vector.shape_cast %77 : vector<1x256xi1> to vector<1x256xi1>
    %79 = vector.broadcast %78 : vector<1x256xi1> to vector<4x256xi1>
    %80 = vector.broadcast %cst_30 : f32 to vector<4x256xf32>
    %81 = arith.select %79, %72, %80 : vector<4x256xi1>, vector<4x256xf32>
    %c32 = arith.constant 32 : index
    %c0_31 = arith.constant 0 : index
    %82 = vector.load %arg7[%c32, %c0_31] : memref<36x256xf32, #tpu.memory_space<vmem>>, vector<4x256xf32>
    tpu.vector_store %arg7[%c32, %c0_31], %81 {strides = array<i32>} : memref<36x256xf32, #tpu.memory_space<vmem>>, vector<4x256xf32>,
    %c0_32 = arith.constant 0 : index
    %c0_33 = arith.constant 0 : index
    %83 = vector.load %arg2[%c0_32, %c0_33] : memref<4x36xbf16, #tpu.memory_space<vmem>>, vector<4x36xbf16>
    %c0_34 = arith.constant 0 : index
    %c0_35 = arith.constant 0 : index
    %84 = vector.load %arg7[%c0_34, %c0_35] : memref<36x256xf32, #tpu.memory_space<vmem>>, vector<36x256xf32>
    %85 = arith.truncf %84 : vector<36x256xf32> to vector<36x256xbf16>
    %cst_36 = arith.constant dense<0.000000e+00> : vector<4x256xf32>
    %86 = tpu.matmul %83, %85, %cst_36 {dimension_numbers = #tpu.dot_dimension_numbers<[1], [0], [0], [1], [0, 0, 1, 1], [], []>} : vector<4x36xbf16>, vector<36x256xbf16>, vector<4x256xf32> -> vector<4x256xf32>
    %c0_37 = arith.constant 0 : index
    %c0_38 = arith.constant 0 : index
    %87 = vector.load %arg3[%c0_37, %c0_38] : memref<4x1xf32, #tpu.memory_space<vmem>>, vector<4x1xf32>
    %88 = vector.broadcast %87 : vector<4x1xf32> to vector<4x256xf32>
    %89 = arith.addf %86, %88 : vector<4x256xf32>
    %cst_39 = arith.constant 0.000000e+00 : f32
    %90 = vector.broadcast %cst_39 : f32 to vector<4x256xf32>
    %91 = arith.maximumf %89, %90 : vector<4x256xf32>
    %c17_i32_40 = arith.constant 17 : i32
    %92 = tpu.dynamic_rotate %91 by %c17_i32_40 dim 1 : vector<4x256xf32>, i32 -> vector<4x256xf32>
    %c16_i32_41 = arith.constant 16 : i32
    %93 = vector.broadcast %c16_i32_41 : i32 to vector<1x256xi32>
    %94 = arith.cmpi sge, %3, %93 : vector<1x256xi32>
    %c1_i32_42 = arith.constant 1 : i32
    %95 = vector.broadcast %c1_i32_42 : i32 to vector<1x256xi32>
    %96 = arith.cmpi sge, %5, %95 : vector<1x256xi32>
    %97 = arith.andi %94, %96 : vector<1x256xi1>
    %cst_43 = arith.constant 0.000000e+00 : f32
    %98 = vector.shape_cast %97 : vector<1x256xi1> to vector<1x256xi1>
    %99 = vector.broadcast %98 : vector<1x256xi1> to vector<4x256xi1>
    %100 = vector.broadcast %cst_43 : f32 to vector<4x256xf32>
    %101 = arith.select %99, %92, %100 : vector<4x256xi1>, vector<4x256xf32>
    %c0_44 = arith.constant 0 : index
    %c0_45 = arith.constant 0 : index
    %102 = vector.load %arg7[%c0_44, %c0_45] : memref<36x256xf32, #tpu.memory_space<vmem>>, vector<4x256xf32>
    tpu.vector_store %arg7[%c0_44, %c0_45], %101 {strides = array<i32>} : memref<36x256xf32, #tpu.memory_space<vmem>>, vector<4x256xf32>,
    %c16_i32_46 = arith.constant 16 : i32
    %103 = tpu.dynamic_rotate %91 by %c16_i32_46 dim 1 : vector<4x256xf32>, i32 -> vector<4x256xf32>
    %c16_i32_47 = arith.constant 16 : i32
    %104 = vector.broadcast %c16_i32_47 : i32 to vector<1x256xi32>
    %105 = arith.cmpi sge, %3, %104 : vector<1x256xi32>
    %cst_48 = arith.constant 0.000000e+00 : f32
    %106 = vector.shape_cast %105 : vector<1x256xi1> to vector<1x256xi1>
    %107 = vector.broadcast %106 : vector<1x256xi1> to vector<4x256xi1>
    %108 = vector.broadcast %cst_48 : f32 to vector<4x256xf32>
    %109 = arith.select %107, %103, %108 : vector<4x256xi1>, vector<4x256xf32>
    %c4_49 = arith.constant 4 : index
    %c0_50 = arith.constant 0 : index
    %110 = vector.load %arg7[%c4_49, %c0_50] : memref<36x256xf32, #tpu.memory_space<vmem>>, vector<4x256xf32>
    tpu.vector_store %arg7[%c4_49, %c0_50], %109 {strides = array<i32>} : memref<36x256xf32, #tpu.memory_space<vmem>>, vector<4x256xf32>,
    %c15_i32_51 = arith.constant 15 : i32
    %111 = tpu.dynamic_rotate %91 by %c15_i32_51 dim 1 : vector<4x256xf32>, i32 -> vector<4x256xf32>
    %c16_i32_52 = arith.constant 16 : i32
    %112 = vector.broadcast %c16_i32_52 : i32 to vector<1x256xi32>
    %113 = arith.cmpi sge, %3, %112 : vector<1x256xi32>
    %c15_i32_53 = arith.constant 15 : i32
    %114 = vector.broadcast %c15_i32_53 : i32 to vector<1x256xi32>
    %115 = arith.cmpi slt, %5, %114 : vector<1x256xi32>
    %116 = arith.andi %113, %115 : vector<1x256xi1>
    %cst_54 = arith.constant 0.000000e+00 : f32
    %117 = vector.shape_cast %116 : vector<1x256xi1> to vector<1x256xi1>
    %118 = vector.broadcast %117 : vector<1x256xi1> to vector<4x256xi1>
    %119 = vector.broadcast %cst_54 : f32 to vector<4x256xf32>
    %120 = arith.select %118, %111, %119 : vector<4x256xi1>, vector<4x256xf32>
    %c8_55 = arith.constant 8 : index
    %c0_56 = arith.constant 0 : index
    %121 = vector.load %arg7[%c8_55, %c0_56] : memref<36x256xf32, #tpu.memory_space<vmem>>, vector<4x256xf32>
    tpu.vector_store %arg7[%c8_55, %c0_56], %120 {strides = array<i32>} : memref<36x256xf32, #tpu.memory_space<vmem>>, vector<4x256xf32>,
    %c1_i32_57 = arith.constant 1 : i32
    %122 = tpu.dynamic_rotate %91 by %c1_i32_57 dim 1 : vector<4x256xf32>, i32 -> vector<4x256xf32>
    %c1_i32_58 = arith.constant 1 : i32
    %123 = vector.broadcast %c1_i32_58 : i32 to vector<1x256xi32>
    %124 = arith.cmpi sge, %5, %123 : vector<1x256xi32>
    %cst_59 = arith.constant 0.000000e+00 : f32
    %125 = vector.shape_cast %124 : vector<1x256xi1> to vector<1x256xi1>
    %126 = vector.broadcast %125 : vector<1x256xi1> to vector<4x256xi1>
    %127 = vector.broadcast %cst_59 : f32 to vector<4x256xf32>
    %128 = arith.select %126, %122, %127 : vector<4x256xi1>, vector<4x256xf32>
    %c12_60 = arith.constant 12 : index
    %c0_61 = arith.constant 0 : index
    %129 = vector.load %arg7[%c12_60, %c0_61] : memref<36x256xf32, #tpu.memory_space<vmem>>, vector<4x256xf32>
    tpu.vector_store %arg7[%c12_60, %c0_61], %128 {strides = array<i32>} : memref<36x256xf32, #tpu.memory_space<vmem>>, vector<4x256xf32>,
    %c16_62 = arith.constant 16 : index
    %c0_63 = arith.constant 0 : index
    %130 = vector.load %arg7[%c16_62, %c0_63] : memref<36x256xf32, #tpu.memory_space<vmem>>, vector<4x256xf32>
    tpu.vector_store %arg7[%c16_62, %c0_63], %91 {strides = array<i32>} : memref<36x256xf32, #tpu.memory_space<vmem>>, vector<4x256xf32>,
    %c255_i32_64 = arith.constant 255 : i32
    %131 = tpu.dynamic_rotate %91 by %c255_i32_64 dim 1 : vector<4x256xf32>, i32 -> vector<4x256xf32>
    %c15_i32_65 = arith.constant 15 : i32
    %132 = vector.broadcast %c15_i32_65 : i32 to vector<1x256xi32>
    %133 = arith.cmpi slt, %5, %132 : vector<1x256xi32>
    %cst_66 = arith.constant 0.000000e+00 : f32
    %134 = vector.shape_cast %133 : vector<1x256xi1> to vector<1x256xi1>
    %135 = vector.broadcast %134 : vector<1x256xi1> to vector<4x256xi1>
    %136 = vector.broadcast %cst_66 : f32 to vector<4x256xf32>
    %137 = arith.select %135, %131, %136 : vector<4x256xi1>, vector<4x256xf32>
    %c20_67 = arith.constant 20 : index
    %c0_68 = arith.constant 0 : index
    %138 = vector.load %arg7[%c20_67, %c0_68] : memref<36x256xf32, #tpu.memory_space<vmem>>, vector<4x256xf32>
    tpu.vector_store %arg7[%c20_67, %c0_68], %137 {strides = array<i32>} : memref<36x256xf32, #tpu.memory_space<vmem>>, vector<4x256xf32>,
    %c241_i32_69 = arith.constant 241 : i32
    %139 = tpu.dynamic_rotate %91 by %c241_i32_69 dim 1 : vector<4x256xf32>, i32 -> vector<4x256xf32>
    %c240_i32_70 = arith.constant 240 : i32
    %140 = vector.broadcast %c240_i32_70 : i32 to vector<1x256xi32>
    %141 = arith.cmpi slt, %3, %140 : vector<1x256xi32>
    %c1_i32_71 = arith.constant 1 : i32
    %142 = vector.broadcast %c1_i32_71 : i32 to vector<1x256xi32>
    %143 = arith.cmpi sge, %5, %142 : vector<1x256xi32>
    %144 = arith.andi %141, %143 : vector<1x256xi1>
    %cst_72 = arith.constant 0.000000e+00 : f32
    %145 = vector.shape_cast %144 : vector<1x256xi1> to vector<1x256xi1>
    %146 = vector.broadcast %145 : vector<1x256xi1> to vector<4x256xi1>
    %147 = vector.broadcast %cst_72 : f32 to vector<4x256xf32>
    %148 = arith.select %146, %139, %147 : vector<4x256xi1>, vector<4x256xf32>
    %c24_73 = arith.constant 24 : index
    %c0_74 = arith.constant 0 : index
    %149 = vector.load %arg7[%c24_73, %c0_74] : memref<36x256xf32, #tpu.memory_space<vmem>>, vector<4x256xf32>
    tpu.vector_store %arg7[%c24_73, %c0_74], %148 {strides = array<i32>} : memref<36x256xf32, #tpu.memory_space<vmem>>, vector<4x256xf32>,
    %c240_i32_75 = arith.constant 240 : i32
    %150 = tpu.dynamic_rotate %91 by %c240_i32_75 dim 1 : vector<4x256xf32>, i32 -> vector<4x256xf32>
    %c240_i32_76 = arith.constant 240 : i32
    %151 = vector.broadcast %c240_i32_76 : i32 to vector<1x256xi32>
    %152 = arith.cmpi slt, %3, %151 : vector<1x256xi32>
    %cst_77 = arith.constant 0.000000e+00 : f32
    %153 = vector.shape_cast %152 : vector<1x256xi1> to vector<1x256xi1>
    %154 = vector.broadcast %153 : vector<1x256xi1> to vector<4x256xi1>
    %155 = vector.broadcast %cst_77 : f32 to vector<4x256xf32>
    %156 = arith.select %154, %150, %155 : vector<4x256xi1>, vector<4x256xf32>
    %c28_78 = arith.constant 28 : index
    %c0_79 = arith.constant 0 : index
    %157 = vector.load %arg7[%c28_78, %c0_79] : memref<36x256xf32, #tpu.memory_space<vmem>>, vector<4x256xf32>
    tpu.vector_store %arg7[%c28_78, %c0_79], %156 {strides = array<i32>} : memref<36x256xf32, #tpu.memory_space<vmem>>, vector<4x256xf32>,
    %c239_i32_80 = arith.constant 239 : i32
    %158 = tpu.dynamic_rotate %91 by %c239_i32_80 dim 1 : vector<4x256xf32>, i32 -> vector<4x256xf32>
    %c240_i32_81 = arith.constant 240 : i32
    %159 = vector.broadcast %c240_i32_81 : i32 to vector<1x256xi32>
    %160 = arith.cmpi slt, %3, %159 : vector<1x256xi32>
    %c15_i32_82 = arith.constant 15 : i32
    %161 = vector.broadcast %c15_i32_82 : i32 to vector<1x256xi32>
    %162 = arith.cmpi slt, %5, %161 : vector<1x256xi32>
    %163 = arith.andi %160, %162 : vector<1x256xi1>
    %cst_83 = arith.constant 0.000000e+00 : f32
    %164 = vector.shape_cast %163 : vector<1x256xi1> to vector<1x256xi1>
    %165 = vector.broadcast %164 : vector<1x256xi1> to vector<4x256xi1>
    %166 = vector.broadcast %cst_83 : f32 to vector<4x256xf32>
    %167 = arith.select %165, %158, %166 : vector<4x256xi1>, vector<4x256xf32>
    %c32_84 = arith.constant 32 : index
    %c0_85 = arith.constant 0 : index
    %168 = vector.load %arg7[%c32_84, %c0_85] : memref<36x256xf32, #tpu.memory_space<vmem>>, vector<4x256xf32>
    tpu.vector_store %arg7[%c32_84, %c0_85], %167 {strides = array<i32>} : memref<36x256xf32, #tpu.memory_space<vmem>>, vector<4x256xf32>,
    %c0_86 = arith.constant 0 : index
    %c0_87 = arith.constant 0 : index
    %169 = vector.load %arg4[%c0_86, %c0_87] : memref<4x36xbf16, #tpu.memory_space<vmem>>, vector<4x36xbf16>
    %c0_88 = arith.constant 0 : index
    %c0_89 = arith.constant 0 : index
    %170 = vector.load %arg7[%c0_88, %c0_89] : memref<36x256xf32, #tpu.memory_space<vmem>>, vector<36x256xf32>
    %171 = arith.truncf %170 : vector<36x256xf32> to vector<36x256xbf16>
    %cst_90 = arith.constant dense<0.000000e+00> : vector<4x256xf32>
    %172 = tpu.matmul %169, %171, %cst_90 {dimension_numbers = #tpu.dot_dimension_numbers<[1], [0], [0], [1], [0, 0, 1, 1], [], []>} : vector<4x36xbf16>, vector<36x256xbf16>, vector<4x256xf32> -> vector<4x256xf32>
    %c0_91 = arith.constant 0 : index
    %c0_92 = arith.constant 0 : index
    %173 = vector.load %arg5[%c0_91, %c0_92] : memref<4x1xf32, #tpu.memory_space<vmem>>, vector<4x1xf32>
    %174 = vector.broadcast %173 : vector<4x1xf32> to vector<4x256xf32>
    %175 = arith.addf %172, %174 : vector<4x256xf32>
    %176 = arith.addf %175, %0 : vector<4x256xf32>
    %c0_93 = arith.constant 0 : index
    %c0_94 = arith.constant 0 : index
    %177 = vector.load %arg6[%c0_93, %c0_94] : memref<4x256xf32, #tpu.memory_space<vmem>>, vector<4x256xf32>
    tpu.vector_store %arg6[%c0_93, %c0_94], %176 {strides = array<i32>} : memref<4x256xf32, #tpu.memory_space<vmem>>, vector<4x256xf32>,
    return
  }
  func.func @transform_0(%arg0: i32) -> (i32, i32) {
    %c0_i32 = arith.constant 0 : i32
    %c0_i32_0 = arith.constant 0 : i32
    return %c0_i32, %arg0 : i32, i32
  }
  func.func @transform_1(%arg0: i32) -> (i32, i32) {
    %c0_i32 = arith.constant 0 : i32
    %c0_i32_0 = arith.constant 0 : i32
    %c0_i32_1 = arith.constant 0 : i32
    return %c0_i32, %c0_i32_0 : i32, i32
  }
  func.func @transform_2(%arg0: i32) -> (i32, i32) {
    %c0_i32 = arith.constant 0 : i32
    %c0_i32_0 = arith.constant 0 : i32
    %c0_i32_1 = arith.constant 0 : i32
    return %c0_i32, %c0_i32_0 : i32, i32
  }
  func.func @transform_3(%arg0: i32) -> (i32, i32) {
    %c0_i32 = arith.constant 0 : i32
    %c0_i32_0 = arith.constant 0 : i32
    %c0_i32_1 = arith.constant 0 : i32
    return %c0_i32, %c0_i32_0 : i32, i32
  }
  func.func @transform_4(%arg0: i32) -> (i32, i32) {
    %c0_i32 = arith.constant 0 : i32
    %c0_i32_0 = arith.constant 0 : i32
    %c0_i32_1 = arith.constant 0 : i32
    return %c0_i32, %c0_i32_0 : i32, i32
  }
  func.func @transform_5(%arg0: i32) -> (i32, i32) {
    %c0_i32 = arith.constant 0 : i32
    %c0_i32_0 = arith.constant 0 : i32
    return %c0_i32, %arg0 : i32, i32
  }
}

</mosaic_0001>

<bundles_post_ra>
// kernel: tpu_custom_call.1
= control target key start
LH: loop header
LB: loop body
LE: loop exit
PB: predicated region body
PF: predicated region fallthrough
CT: control target
= control target key end

     0   :  { %10 = vsyncpa [#allocation4], 0  ;;  %s1395_s0 = inlined_call_operand.hbm [shape: f32[4,512], index: 0, kind: input, shape index: {}]   ;;  %s1396_s1 = inlined_call_operand.vmem [shape: bf16[4,36], index: 1, kind: input, shape index: {}]   ;;  %s1397_s2 = inlined_call_operand.vmem [shape: f32[4,1], index: 2, kind: input, shape index: {}]   ;;  %s1398_s3 = inlined_call_operand.vmem [shape: bf16[4,36], index: 3, kind: input, shape index: {}]   ;;  %s1399_s4 = inlined_call_operand.vmem [shape: f32[4,1], index: 4, kind: input, shape index: {}]   ;;  %s1400_s5 = inlined_call_operand.hbm [shape: f32[4,512], index: 5, kind: output, shape index: {}]  }
   0x1   :  { %12 = vsyncpa [#allocation4 + $0x1], 0 }
   0x2   :  { %13 = vsyncpa [#allocation5], 0 }
   0x3   :  { %15 = vsyncpa [#allocation5 + $0x1], 0  ;;  %s977_s18 = smov 0   ;;  %s979_s19 = smov 0  }
   0x4   :  { %s981_s20 = smov 0   ;;  %s983_s21 = smov 0  }
   0x5 LB: > { %s998_s22 = sadd.s32 4294967295, %s934_s21   ;;  %s765_s23 = sadd.s32 4294967294, %s934_s21   ;;  %s934_s21 = sphi %s983_s21, %s1441_s21   ;;  %s930_s20 = sphi %s981_s20, %s1440_s20   ;;  %s926_s19 = sphi %s979_s19, %s1439_s19   ;;  %s922_s18 = sphi %s977_s18, %s1438_s18  }
   0x6   : > { %s1002_s24 = sadd.s32 1, %s934_s21   ;;  %s28_s25 = sadd.s32 1, %s930_s20 }
   0x7   : > { %s25_s26 = ssub.s32 %s934_s21, %s1002_s24  ;;  %p35_p0 = scmp.ne.s32.totalorder %s930_s20, %s926_s19 }
   0x8   : > { %p26_p1 = scmp.eq.s32.totalorder %s25_s26, 0  ;;  %p36_p2 = scmp.eq.s32.totalorder %s934_s21, 0 }
   0x9   : > { %p41_p3 = scmp.ne.s32.totalorder %s926_s19, %s922_s18  ;;  %p42_p4 = scmp.eq.s32.totalorder %s998_s22, 0 }
   0xa   : > { %s1014_s27 = scalar_select %p26_p1, %s930_s20, %s28_s25  }
   0xb   : > { %p1016_p5 = por %p36_p2, %p35_p0  ;;  %p1020_p6 = por %p42_p4, %p41_p3 }
   0xc   : > { %p149_p7 = scmp.eq.s32.totalorder %s998_s22, 1  ;;  %p155_p8 = scmp.eq.s32.totalorder %s765_s23, 1 }
   0xd   : > { %s1408_s29 = scalar_select %p1020_p6, 1, 0 }
   0xe   : > { %p797_p10 = scmp.lt.s32.totalorder %s934_s21, 2  ;;  %p1027_p11 = por %p149_p7, %p35_p0 }
   0xf   : > { %p1031_p12 = por %p155_p8, %p41_p3  ;;  %s187_s7 = sand.u32 1, %s930_s20  }
  0x10   : > { %s1409_s30 = scalar_select %p1027_p11, 1, 0 }
  0x11   : > { %s1410_s6 = scalar_select %p1031_p12, 1, 0 }
  0x12   : > { %s783_s8 = sshll.u32 %s934_s21, 7  ;;  %s768_s9 = sshll.u32 %s187_s7, 3 }
  0x13   : > { %s1040_s12 = scalar_lea.hbm %s1395_s0, %s783_s8  ;;  %s191_s13 = scalar_lea.vmem [#allocation3], %s768_s9 }
  0x14   : > { %s199_s14 = sshll.u32 %s191_s13, 4  ;;  %p1044_p13 = pnand %p797_p10, %p1016_p5  ;;  %s1048_s14 = int_to_ptr.vmem [resolvable:$true] %s199_s14 }
  0x15   : > { %s188_s16 = scalar_lea.sflag [#allocation4], %s187_s7  ;;  %s842_s17 = scalar_lea.hbm %s1040_s12, 128 }
  0x16   : > { %p843_p2 = scmp.ne.s32.totalorder %s1040_s12, %s842_s17  ;;  %p844_p3 = pneg %p1044_p13 }
  0x17   : > { %s847_s26 = scalar_lea.hbm %s1395_s0, 256  ;;  %p848_p5 = scmp.lt.s32.totalorder %s1040_s12, %s1395_s0 }
  0x18   : > { %p845_p4 = pnand %p844_p3, %p843_p2  ;;  %p849_p8 = scmp.lt.s32.totalorder %s847_s26, %s842_s17 }
  0x1a   : > { %p846_p7 = pneg %p845_p4  ;;  %p850_p10 = por %p849_p8, %p848_p5 }
  0x1c   : > { %p851_p9 = pnand %p850_p10, %p846_p7 }
  0x1e   : > { %854 = shalt.err (!%p851_p9)
}
  0x1f   : > { %s855_s7 = scalar_lea.vmem %s1048_s14, 128  ;;  %s936_s9 = smov [#allocation3]  }
  0x20   : > { %p856_p0 = scmp.ne.s32.totalorder %s1048_s14, %s855_s7  ;;  %s860_s10 = sshll.u32 %s936_s9, 4  ;;  %s861_s10 = int_to_ptr.vmem [resolvable:$false] %s860_s10 }
  0x21   : > { %s862_s11 = scalar_lea.vmem %s861_s10, 256  ;;  %p863_p4 = scmp.lt.s32.totalorder %s1048_s14, %s861_s10 }
  0x22   : > { %p858_p1 = pnand %p856_p0, %p844_p3  ;;  %p864_p12 = scmp.lt.s32.totalorder %s862_s11, %s855_s7 }
  0x24   : > { %p859_p2 = pneg %p858_p1  ;;  %p865_p11 = por %p864_p12, %p863_p4 }
  0x26   : > { %p866_p6 = pnand %p865_p11, %p859_p2 }
  0x28   : > { %869 = shalt.err (!%p866_p6)
}
  0x29   : > { %792 = dma.hbm_to_vmem [thread:$0]  (!%p1044_p13), %s1040_s12, 128, %s1048_s14, %s188_s16  }
  0x2a   : > { %p1412_p9 = scmp.lt.s32.totalorder %s934_s21, 3  ;;  %p1413_p7 = scmp.ge.s32.totalorder %s934_s21, 1 }
  0x2c   : > { %p205_p0 = pnand %p1413_p7, %p1412_p9 }
  0x2d   : > { %s1075_s13 = sand.u32 (!%p205_p0), 1, %s926_s19   ;;  %p1414_p6 = scmp.ne.s32.totalorder (!%p205_p0), %s1408_s29, 0 }
  0x2e   : > { %208 = sbr.rel (%p205_p0) target bundleno = 786 (0x312), region = 40  ;;  %s772_s17 = sshll.u32 (!%p205_p0), %s1075_s13, 3 }
  0x2f   : > { %s211_s23 = scalar_lea.sflag (!%p205_p0), [#allocation4], %s1075_s13  ;;  %s214_s15 = scalar_lea.vmem (!%p205_p0), [#allocation3], %s772_s17 }
  0x33   : > { %913 = dma.done.wait (%p1414_p6), %s211_s23, 128  }
  0x34   : > { %915 = vsyncadd (%p1414_p6), %s211_s23, 4294967168  ;;  %v1085_v0 = vld [vmem:[%s214_s15] sm:$0xff]  ;;  %s937_s12 = smov 127   ;;  %s938_s14 = smov 111   ;;  %v945_v2 = vmov 0   ;;  %v245_v4 = vlaneseq  ;;  %vm444_vm14 = vcmask 1041408  }
  0x35   : > { %339 = vrot.lane.b32.xlu1 %v1085_v0, %s937_s12  ;;  %337 = vst [vmem:[#allocation2 + $0x48] sm:$0xf] %v1085_v0  ;;  %400 = vrot.lane.b32.xlu0 %v1085_v0, %s938_s14  ;;  %v1094_v1 = vcombine.high %v1085_v0, %v1085_v0  ;;  %s939_s29 = smov 112   ;;  %s940_s16 = smov 113   ;;  %v434_v3 = vld [vmem:[%s1397_s2] sm:$0xf] }
  0x36   : > { %s941_s25 = smov 1   ;;  %s942_s26 = smov 16   ;;  %483 = vmatprep.mubr.bf16.mxu0 %v945_v2  ;;  %840 = vset.pattern.permute.xlu0 %v945_v2  ;;  %v1128_v5 = vand.u32 127, %v245_v4  ;;  %v600_v12 = vld [vmem:[%s1398_s3] sm:$0x3] }
  0x37   : > { %338 = vst [vmem:[#allocation2 + $0x28] sm:$0xf] %v1094_v1  ;;  %s943_s28 = smov 17   ;;  %s944_s8 = smov 15   ;;  %664 = vmatprep.mubr.bf16.mxu1 %v945_v2 }
  0x38   : > { %v247_v6 = vadd.s32 128, %v1128_v5  ;;  %v250_v7 = vand.u32 15, %v1128_v5  ;;  %vm343_vm0 = vcmp.lt.s32.totalorder %v1128_v5, 127  ;;  %vm383_vm4 = vcmp.lt.s32.totalorder %v1128_v5, 112  ;;  %s681_s7 = scalar_lea.sflag [#allocation5], %s1075_s13  ;;  %p1435_p12 = scmp.ne.s32.totalorder %s1409_s30, 0 }
  0x39   : > { %379 = vrot.lane.b32.xlu0 %v1085_v0, %s939_s29  ;;  %341 = vrot.lane.b32.xlu1 %v1094_v1, %s937_s12  ;;  %vm404_vm5 = vcmp.lt.s32.totalorder %v1128_v5, 111  ;;  %vm364_vm8 = vcmp.lt.s32.totalorder %v1128_v5, 113  ;;  %v248_v40 = vand.u32 255, %v1128_v5  ;;  %vm1404_vm11 = vcmp.lt.s32.totalorder %v1128_v5, 1 }
  0x3a   : > { %v251_v8 = vand.u32 15, %v247_v6  ;;  %v249_v11 = vand.u32 255, %v247_v6  ;;  %vm1133_vm1 = vcmp.lt.s32.totalorder %v250_v7, 15  ;;  %vm1181_vm9 = vcmp.ge.s32.totalorder %v250_v7, 1 }
  0x3b   : > { %vm1403_vm12 = vcmp.lt.s32.totalorder %v1128_v5, 16  ;;  %vm1207_vm13 = vcmp.ge.s32.totalorder %v248_v40, 16  ;;  %vm1405_vm15 = vcmp.lt.s32.totalorder %v1128_v5, 17 }
  0x3c   : > { %vm1137_vm2 = vcmp.lt.s32.totalorder %v251_v8, 15  ;;  %vm1141_vm3 = vcmp.lt.s32.totalorder %v249_v11, 240  ;;  %vm1159_vm7 = vcmp.ge.s32.totalorder %v251_v8, 1 }
  0x3d   : > { %381 = vrot.lane.b32.xlu1 %v1094_v1, %s939_s29  ;;  %402 = vrot.lane.b32.xlu0 %v1094_v1, %s938_s14  ;;  %vm408_vm6 = vmand %vm1141_vm3, %vm1137_vm2 }
  0x3e   : > { %vm370_vm10 = vmand %vm1141_vm3, %vm1159_vm7 }
  0x41   : > { %362 = vrot.lane.b32.xlu1 %v1094_v1, %s940_s16  ;;  %360 = vrot.lane.b32.xlu0 %v1085_v0, %s940_s16 }
  0x45   : > { %318 = vrot.lane.b32.xlu1 %v1094_v1, %s941_s25  ;;  %316 = vrot.lane.b32.xlu0 %v1085_v0, %s941_s25 }
  0x49   : > { %278 = vrot.lane.b32.xlu1 %v1094_v1, %s942_s26  ;;  %276 = vrot.lane.b32.xlu0 %v1085_v0, %s942_s26 }
  0x4d   : > { %257 = vrot.lane.b32.xlu1 %v1094_v1, %s943_s28  ;;  %255 = vrot.lane.b32.xlu0 %v1085_v0, %s943_s28 }
  0x51   : > { %299 = vrot.lane.b32.xlu1 %v1094_v1, %s944_s8  ;;  %297 = vrot.lane.b32.xlu0 %v1085_v0, %s944_s8 }
  0x55   : > { %437 = vperm.xlu0 %840, %v434_v3  }
  0xa7   : > { %v340_v9 = vpop.permute.xlu1 %339  ;;  %v401_v10 = vpop.permute.xlu0 %400 }
  0xab   : > { %v380_v14 = vpop.permute.xlu0 %379  ;;  %v342_v15 = vpop.permute.xlu1 %341 }
  0xac   : > { %v344_v17 = vsel %vm343_vm0, %v340_v9, %v342_v15  ;;  %v345_v18 = vsel %vm343_vm0, %v342_v15, %v340_v9 }
  0xad   : > { %v350_v19 = vsel %vm1133_vm1, %v344_v17, 0.0  ;;  %v351_v20 = vsel %vm1137_vm2, %v345_v18, 0.0 }
  0xae   : > { %v354_v21 = vrot.slane %v350_v19, 4  ;;  %v355_v22 = vrot.slane %v351_v20, 4 }
  0xaf   : > { %v382_v23 = vpop.permute.xlu1 %381  ;;  %v403_v24 = vpop.permute.xlu0 %402 }
  0xb0   : > { %358 = vst [vmem:[#allocation2 + $0x48] sm:$0xf0] %v354_v21  ;;  %359 = vst [vmem:[#allocation2 + $0x28] sm:$0xf0] %v355_v22  ;;  %v384_v26 = vsel %vm383_vm4, %v380_v14, %v382_v23  ;;  %v385_v27 = vsel %vm383_vm4, %v382_v23, %v380_v14  ;;  %v405_v28 = vsel %vm404_vm5, %v401_v10, %v403_v24 }
  0xb1   : > { %v406_v29 = vsel %vm404_vm5, %v403_v24, %v401_v10  ;;  %v391_v30 = vsel %vm1141_vm3, %v385_v27, 0.0  ;;  %v394_v31 = vrot.slane %v384_v26, 4  ;;  %v413_v32 = vsel %vm1133_vm1, %v405_v28, 0.0 }
  0xb2   : > { %v414_v33 = vsel %vm408_vm6, %v406_v29, 0.0  ;;  %v395_v34 = vrot.slane %v391_v30, 4  ;;  %415 = vst [vmem:[#allocation2 + $0x40] sm:$0xf] %v413_v32 }
  0xb3   : > { %416 = vst [vmem:[#allocation2 + $0x38] sm:$0xf] %v414_v33  ;;  %398 = vst [vmem:[#allocation2 + $0x8] sm:$0xf0] %v394_v31  ;;  %v363_v36 = vpop.permute.xlu1 %362  ;;  %v361_v37 = vpop.permute.xlu0 %360  ;;  %v417_v31 = vld [vmem:[%s1396_s1] sm:$0x3] }
  0xb4   : > { %399 = vst [vmem:[#allocation2 + $0x20] sm:$0xf0] %v395_v34  ;;  %v365_v38 = vsel %vm364_vm8, %v361_v37, %v363_v36  ;;  %v366_v39 = vsel %vm364_vm8, %v363_v36, %v361_v37 }
  0xb5   : > { %v375_v41 = vsel %vm1181_vm9, %v365_v38, 0.0  ;;  %v376_v42 = vsel %vm370_vm10, %v366_v39, 0.0 }
  0xb6   : > { %377 = vst [vmem:[#allocation2 + $0x8] sm:$0xf] %v375_v41  ;;  %378 = vst [vmem:[#allocation2 + $0x20] sm:$0xf] %v376_v42  ;;  %v617_v42 = vld [vmem:[%s1399_s4] sm:$0xf] }
  0xb7   : > { %v319_v43 = vpop.permute.xlu1 %318  ;;  %v317_v44 = vpop.permute.xlu0 %316  ;;  %v423_v61 = vld [vmem:[#allocation2 + $0x28] sm:$0xff] }
  0xb8   : > { %v321_v45 = vsel %vm1404_vm11, %v317_v44, %v319_v43  ;;  %v322_v46 = vsel %vm1404_vm11, %v319_v43, %v317_v44  ;;  %v422_v3 = vld [vmem:[#allocation2 + $0x48] sm:$0xff]  ;;  %vm1406_vm11 = vcmp.lt.s32.totalorder %v1128_v5, 15 }
  0xb9   : > { %v327_v48 = vsel %vm1181_vm9, %v322_v46, 0.0  ;;  %v328_v49 = vsel %vm1159_vm7, %v321_v45, 0.0  ;;  %v426_v51 = vld [vmem:[#allocation2 + $0x40] sm:$0xf] }
  0xba   : > { %v427_v50 = vld [vmem:[#allocation2 + $0x38] sm:$0xf]  ;;  %v331_v52 = vrot.slane %v327_v48, 4  ;;  %v332_v53 = vrot.slane %v328_v49, 4  ;;  %v432_v55 = vpack.c.bf16 %v426_v51, %v426_v51 }
  0xbb   : > { %v433_v54 = vpack.c.bf16 %v427_v50, %v427_v50  ;;  %v279_v56 = vpop.permute.xlu1 %278  ;;  %v277_v57 = vpop.permute.xlu0 %276 }
  0xbc   : > { %335 = vst [vmem:[#allocation2 + $0x18] sm:$0xf0] %v331_v52  ;;  %336 = vst [vmem:[#allocation2 + $0x10] sm:$0xf0] %v332_v53  ;;  %v281_v58 = vsel %vm1403_vm12, %v277_v57, %v279_v56  ;;  %v282_v59 = vsel %vm1403_vm12, %v279_v56, %v277_v57  ;;  %v446_v60 = vsel %vm444_vm14, %v432_v55, 0 }
  0xbd   : > { %774 = vmatprep.subr.msk.bf16.mxu0 %vm444_vm14, %v433_v54  ;;  %v287_v62 = vsel %vm1207_vm13, %v282_v59, 0.0  ;;  %v292_v63 = vrot.slane %v281_v58, 4  ;;  %v425_v2 = vld [vmem:[#allocation2 + $0x20] sm:$0xff]  ;;  %v424_v4 = vld [vmem:[#allocation2 + $0x8] sm:$0xff]  ;;  %vm266_vm12 = vmand %vm1207_vm13, %vm1181_vm9 }
  0xbe   : > { %462 = vmatpush1.bf16.msra.mxu0 %v446_v60  ;;  %v291_v6 = vrot.slane %v287_v62, 4  ;;  %v431_v7 = vpack.c.bf16 %v425_v2, %v423_v61  ;;  %v430_v8 = vpack.c.bf16 %v424_v4, %v422_v3 }
  0xbf   : > { %296 = vst [vmem:[#allocation2] sm:$0xf0] %v292_v63  ;;  %v258_v9 = vpop.permute.xlu1 %257  ;;  %v256_v10 = vpop.permute.xlu0 %255 }
  0xc0   : > { %295 = vst [vmem:[#allocation2 + $0x30] sm:$0xf0] %v291_v6  ;;  %v260_v11 = vsel %vm1405_vm15, %v256_v10, %v258_v9  ;;  %v261_v14 = vsel %vm1405_vm15, %v258_v9, %v256_v10  ;;  %463 = vmatprep.subr.bf16.mxu0 %v431_v7  ;;  %vm306_vm15 = vmand %vm1207_vm13, %vm1133_vm1 }
  0xc1   : > { %v272_v15 = vsel %vm266_vm12, %v261_v14, 0.0  ;;  %v273_v17 = vsel %vm1159_vm7, %v260_v11, 0.0 }
  0xc2   : > { %464 = vmatpush1.bf16.msra.mxu0 %v430_v8  ;;  %274 = vst [vmem:[#allocation2 + $0x30] sm:$0xf] %v272_v15  ;;  %275 = vst [vmem:[#allocation2] sm:$0xf] %v273_v17 }
  0xc3   : > { %v300_v18 = vpop.permute.xlu1 %299  ;;  %v298_v19 = vpop.permute.xlu0 %297 }
  0xc4   : > { %v302_v20 = vsel %vm1406_vm11, %v298_v19, %v300_v18  ;;  %v303_v21 = vsel %vm1406_vm11, %v300_v18, %v298_v19  ;;  %vm440_vm11 = vcmask 293888  }
  0xc5   : > { %v312_v22 = vsel %vm306_vm15, %v303_v21, 0.0  ;;  %v313_v23 = vsel %vm1137_vm2, %v302_v20, 0.0 }
  0xc6   : > { %314 = vst [vmem:[#allocation2 + $0x18] sm:$0xf] %v312_v22  ;;  %315 = vst [vmem:[#allocation2 + $0x10] sm:$0xf] %v313_v23 }
  0xc9   : > { %v419_v24 = vld [vmem:[#allocation2] sm:$0xff]  ;;  %v418_v27 = vld [vmem:[#allocation2 + $0x30] sm:$0xff] }
  0xcd   : > { %v421_v26 = vld [vmem:[#allocation2 + $0x10] sm:$0xff]  ;;  %v420_v28 = vld [vmem:[#allocation2 + $0x18] sm:$0xff] }
  0xce   : > { %v429_v29 = vpack.c.bf16 %v421_v26, %v419_v24  ;;  %v428_v30 = vpack.c.bf16 %v420_v28, %v418_v27 }
  0xd0   : > { %465 = vmatprep.subr.bf16.mxu0 %v429_v29  ;;  %v438_v32 = vpop.permute.xlu0 %437 }
  0xd1   : > { %466 = vmatpush1.bf16.msra.mxu0 %v428_v30 }
  0xd4   : > { %775 = vmatmul.mubr.msk.bf16.vlgmr.msra.gmra.mxu0 %vm440_vm11, %v417_v31 }
 0x194   : > { %v485_v33 = vpop.f32.mrf.mxu0 }
 0x195   : > { %v486_v34 = vadd.f32 %v485_v33, %v438_v32 }
 0x196   : > { %v487_v36 = vpop.f32.mrf.mxu0 }
 0x197   : > { %v492_v37 = vmax.f32 %v486_v34, 0.0  ;;  %v488_v38 = vadd.f32 %v487_v36, %v438_v32 }
 0x198   : > { %v489_v39 = vpop.f32.mrf.mxu0 }
 0x199   : > { %546 = vst [vmem:[#allocation2 + $0x48] sm:$0xf] %v492_v37  ;;  %v493_v40 = vmax.f32 %v488_v38, 0.0  ;;  %548 = vrot.lane.b32.xlu0 %v492_v37, %s937_s12  ;;  %590 = vrot.lane.b32.xlu1 %v492_v37, %s938_s14 }
 0x19a   : > { %v490_v41 = vpop.f32.mrf.mxu0 }
 0x19b   : > { %547 = vst [vmem:[#allocation2 + $0x28] sm:$0xf] %v493_v40 }
 0x19d   : > { %574 = vrot.lane.b32.xlu0 %v492_v37, %s939_s29  ;;  %592 = vrot.lane.b32.xlu1 %v493_v40, %s938_s14 }
 0x1a1   : > { %564 = vrot.lane.b32.xlu0 %v492_v37, %s940_s16  ;;  %550 = vrot.lane.b32.xlu1 %v493_v40, %s937_s12 }
 0x1a5   : > { %530 = vrot.lane.b32.xlu0 %v492_v37, %s941_s25  ;;  %576 = vrot.lane.b32.xlu1 %v493_v40, %s939_s29  ;;  %s784_s29 = sshll.u32 %s998_s22, 7  ;;  %s946_s22 = smov [#allocation6]  }
 0x1a9   : > { %504 = vrot.lane.b32.xlu0 %v492_v37, %s942_s26  ;;  %566 = vrot.lane.b32.xlu1 %v493_v40, %s940_s16  ;;  %s240_s16 = scalar_lea.vmem [#allocation6], %s772_s17  ;;  %s874_s17 = sshll.u32 %s946_s22, 4  ;;  %s875_s17 = int_to_ptr.vmem [resolvable:$false] %s874_s17 }
 0x1aa   : > { %s876_s10 = scalar_lea.vmem %s875_s17, 256 }
 0x1ad   : > { %494 = vrot.lane.b32.xlu0 %v492_v37, %s943_s28  ;;  %532 = vrot.lane.b32.xlu1 %v493_v40, %s941_s25  ;;  %s695_s25 = sshll.u32 %s240_s16, 4  ;;  %s696_s25 = int_to_ptr.vmem [resolvable:$true] %s695_s25 }
 0x1ae   : > { %s870_s9 = scalar_lea.vmem %s696_s25, 128  ;;  %p877_p3 = scmp.lt.s32.totalorder %s696_s25, %s875_s17 }
 0x1af   : > { %p871_p11 = scmp.ne.s32.totalorder %s696_s25, %s870_s9  ;;  %p878_p5 = scmp.lt.s32.totalorder %s876_s10, %s870_s9 }
 0x1b1   : > { %520 = vrot.lane.b32.xlu0 %v492_v37, %s944_s8  ;;  %506 = vrot.lane.b32.xlu1 %v493_v40, %s942_s26  ;;  %p872_p13 = pnand %p871_p11, %p1435_p12  ;;  %p879_p8 = por %p878_p5, %p877_p3 }
 0x1b3   : > { %p873_p1 = pneg %p872_p13 }
 0x1b5   : > { %620 = vperm.xlu0 %840, %v617_v42   ;;  %496 = vrot.lane.b32.xlu1 %v493_v40, %s943_s28  ;;  %p880_p10 = pnand %p879_p8, %p873_p1 }
 0x1b9   : > { %522 = vrot.lane.b32.xlu1 %v493_v40, %s944_s8  ;;  %s693_s8 = scalar_lea.hbm %s1400_s5, %s784_s29 }
 0x20b   : > { %v549_v43 = vpop.permute.xlu0 %548  ;;  %v591_v44 = vpop.permute.xlu1 %590 }
 0x20f   : > { %v575_v45 = vpop.permute.xlu0 %574  ;;  %v593_v46 = vpop.permute.xlu1 %592 }
 0x210   : > { %v594_v48 = vsel %vm404_vm5, %v591_v44, %v593_v46  ;;  %v595_v49 = vsel %vm404_vm5, %v593_v46, %v591_v44 }
 0x211   : > { %v596_v50 = vsel %vm1133_vm1, %v594_v48, 0.0  ;;  %v597_v51 = vsel %vm408_vm6, %v595_v49, 0.0  ;;  %vm1431_vm6 = vcmp.lt.s32.totalorder %v1128_v5, 17 }
 0x212   : > { %598 = vst [vmem:[#allocation2 + $0x40] sm:$0xf] %v596_v50  ;;  %599 = vst [vmem:[#allocation2 + $0x38] sm:$0xf] %v597_v51 }
 0x213   : > { %v565_v52 = vpop.permute.xlu0 %564  ;;  %v551_v53 = vpop.permute.xlu1 %550 }
 0x214   : > { %v552_v54 = vsel %vm343_vm0, %v549_v43, %v551_v53  ;;  %v553_v55 = vsel %vm343_vm0, %v551_v53, %v549_v43  ;;  %vm1427_vm0 = vcmp.lt.s32.totalorder %v1128_v5, 1 }
 0x215   : > { %v554_v56 = vsel %vm1133_vm1, %v552_v54, 0.0  ;;  %v555_v57 = vsel %vm1137_vm2, %v553_v55, 0.0 }
 0x216   : > { %v558_v58 = vrot.slane %v554_v56, 4  ;;  %v559_v59 = vrot.slane %v555_v57, 4 }
 0x217   : > { %v577_v60 = vpop.permute.xlu1 %576  ;;  %v531_v63 = vpop.permute.xlu0 %530 }
 0x218   : > { %562 = vst [vmem:[#allocation2 + $0x48] sm:$0xf0] %v558_v58  ;;  %563 = vst [vmem:[#allocation2 + $0x28] sm:$0xf0] %v559_v59  ;;  %v578_v61 = vsel %vm383_vm4, %v575_v45, %v577_v60  ;;  %v579_v62 = vsel %vm383_vm4, %v577_v60, %v575_v45 }
 0x219   : > { %v581_v2 = vsel %vm1141_vm3, %v579_v62, 0.0  ;;  %v584_v3 = vrot.slane %v578_v61, 4  ;;  %v610_v4 = vld [vmem:[#allocation2 + $0x38] sm:$0xf]  ;;  %v609_v6 = vld [vmem:[#allocation2 + $0x40] sm:$0xf]  ;;  %vm1428_vm4 = vmmov %vm1427_vm0 }
 0x21a   : > { %v585_v7 = vrot.slane %v581_v2, 4  ;;  %v616_v8 = vpack.c.bf16 %v610_v4, %v610_v4  ;;  %v615_v9 = vpack.c.bf16 %v609_v6, %v609_v6  ;;  %vm1429_vm3 = vcmp.lt.s32.totalorder %v1128_v5, 16 }
 0x21b   : > { %588 = vst [vmem:[#allocation2 + $0x8] sm:$0xf0] %v584_v3  ;;  %v567_v10 = vpop.permute.xlu1 %566  ;;  %v505_v19 = vpop.permute.xlu0 %504  ;;  %vm1430_vm5 = vmmov %vm1429_vm3 }
 0x21c   : > { %589 = vst [vmem:[#allocation2 + $0x20] sm:$0xf0] %v585_v7  ;;  %v568_v11 = vsel %vm364_vm8, %v565_v52, %v567_v10  ;;  %v569_v14 = vsel %vm364_vm8, %v567_v10, %v565_v52  ;;  %776 = vmatprep.subr.msk.bf16.mxu1 %vm444_vm14, %v616_v8  ;;  %v627_v15 = vsel %vm444_vm14, %v615_v9, 0  ;;  %vm1432_vm8 = vmmov %vm1431_vm6 }
 0x21d   : > { %v570_v17 = vsel %vm1181_vm9, %v568_v11, 0.0  ;;  %v571_v18 = vsel %vm370_vm10, %v569_v14, 0.0  ;;  %643 = vmatpush1.bf16.msra.mxu1 %v627_v15  ;;  %vm1433_vm10 = vcmp.lt.s32.totalorder %v1128_v5, 15 }
 0x21e   : > { %572 = vst [vmem:[#allocation2 + $0x8] sm:$0xf] %v570_v17  ;;  %573 = vst [vmem:[#allocation2 + $0x20] sm:$0xf] %v571_v18 }
 0x21f   : > { %v533_v20 = vpop.permute.xlu1 %532  ;;  %v606_v30 = vld [vmem:[#allocation2 + $0x28] sm:$0xff]  ;;  %v495_v31 = vpop.permute.xlu0 %494  ;;  %vm1434_vm14 = vmmov %vm1433_vm10 }
 0x220   : > { %v534_v21 = vsel %vm1427_vm0, %v531_v63, %v533_v20  ;;  %v535_v22 = vsel %vm1428_vm4, %v533_v20, %v531_v63  ;;  %v605_v36 = vld [vmem:[#allocation2 + $0x48] sm:$0xff] }
 0x221   : > { %v536_v23 = vsel %vm1181_vm9, %v535_v22, 0.0  ;;  %v537_v16 = vsel %vm1159_vm7, %v534_v21, 0.0 }
 0x222   : > { %v540_v24 = vrot.slane %v536_v23, 4  ;;  %v541_v26 = vrot.slane %v537_v16, 4 }
 0x223   : > { %v507_v27 = vpop.permute.xlu1 %506  ;;  %v521_v46 = vpop.permute.xlu0 %520 }
 0x224   : > { %544 = vst [vmem:[#allocation2 + $0x18] sm:$0xf0] %v540_v24  ;;  %545 = vst [vmem:[#allocation2 + $0x10] sm:$0xf0] %v541_v26  ;;  %v508_v28 = vsel %vm1429_vm3, %v505_v19, %v507_v27  ;;  %v509_v29 = vsel %vm1430_vm5, %v507_v27, %v505_v19 }
 0x225   : > { %v510_v32 = vsel %vm1207_vm13, %v509_v29, 0.0  ;;  %v515_v33 = vrot.slane %v508_v28, 4  ;;  %v608_v34 = vld [vmem:[#allocation2 + $0x20] sm:$0xff]  ;;  %v607_v37 = vld [vmem:[#allocation2 + $0x8] sm:$0xff] }
 0x226   : > { %v514_v38 = vrot.slane %v510_v32, 4  ;;  %v614_v39 = vpack.c.bf16 %v608_v34, %v606_v30  ;;  %v613_v40 = vpack.c.bf16 %v607_v37, %v605_v36 }
 0x227   : > { %519 = vst [vmem:[#allocation2] sm:$0xf0] %v515_v33  ;;  %v497_v41 = vpop.permute.xlu1 %496 }
 0x228   : > { %518 = vst [vmem:[#allocation2 + $0x30] sm:$0xf0] %v514_v38  ;;  %v498_v42 = vsel %vm1431_vm6, %v495_v31, %v497_v41  ;;  %v499_v43 = vsel %vm1432_vm8, %v497_v41, %v495_v31  ;;  %644 = vmatprep.subr.bf16.mxu1 %v614_v39 }
 0x229   : > { %v500_v44 = vsel %vm266_vm12, %v499_v43, 0.0  ;;  %v501_v45 = vsel %vm1159_vm7, %v498_v42, 0.0  ;;  %645 = vmatpush1.bf16.msra.mxu1 %v613_v40 }
 0x22a   : > { %502 = vst [vmem:[#allocation2 + $0x30] sm:$0xf] %v500_v44  ;;  %503 = vst [vmem:[#allocation2] sm:$0xf] %v501_v45 }
 0x22b   : > { %v523_v48 = vpop.permute.xlu1 %522 }
 0x22c   : > { %v524_v49 = vsel %vm1433_vm10, %v521_v46, %v523_v48  ;;  %v525_v50 = vsel %vm1434_vm14, %v523_v48, %v521_v46 }
 0x22d   : > { %v526_v35 = vsel %vm306_vm15, %v525_v50, 0.0  ;;  %v527_v25 = vsel %vm1137_vm2, %v524_v49, 0.0 }
 0x22e   : > { %528 = vst [vmem:[#allocation2 + $0x18] sm:$0xf] %v526_v35  ;;  %529 = vst [vmem:[#allocation2 + $0x10] sm:$0xf] %v527_v25 }
 0x230   : > { %v621_v13 = vpop.permute.xlu0 %620 }
 0x231   : > { %v602_v51 = vld [vmem:[#allocation2] sm:$0xff]  ;;  %v601_v53 = vld [vmem:[#allocation2 + $0x30] sm:$0xff] }
 0x235   : > { %v604_v52 = vld [vmem:[#allocation2 + $0x10] sm:$0xff]  ;;  %v603_v54 = vld [vmem:[#allocation2 + $0x18] sm:$0xff] }
 0x236   : > { %v612_v55 = vpack.c.bf16 %v604_v52, %v602_v51  ;;  %v611_v5 = vpack.c.bf16 %v603_v54, %v601_v53 }
 0x238   : > { %646 = vmatprep.subr.bf16.mxu1 %v612_v55 }
 0x239   : > { %647 = vmatpush1.bf16.msra.mxu1 %v611_v5 }
 0x23c   : > { %777 = vmatmul.mubr.msk.bf16.vlgmr.msra.gmra.mxu1 %vm440_vm11, %v600_v12 }
 0x2fc   : > { %v666_v47 = vpop.f32.mrf.mxu1 }
 0x2fd   : > { %v667_v56 = vadd.f32 %v666_v47, %v621_v13 }
 0x2fe   : > { %v668_v57 = vpop.f32.mrf.mxu1 }
 0x2ff   : > { %v669_v58 = vadd.f32 %v668_v57, %v621_v13  ;;  %v673_v60 = vadd.f32 %v667_v56, %v1085_v0 }
 0x300   : > { %v670_v59 = vpop.f32.mrf.mxu1 }
 0x301   : > { %v674_v61 = vadd.f32 %v669_v58, %v1094_v1 }
 0x302   : > { %v671_v62 = vpop.f32.mrf.mxu1 }
 0x303   : > { %v677_v63 = vcombine.low %v673_v60, %v674_v61 }
 0x305   : > { %679 = vst [vmem:[%s240_s16] sm:$0xff] %v677_v63 }
 0x306   : > { %883 = shalt.err (!%p880_p10)
}
 0x307   : > { %s884_s11 = scalar_lea.hbm %s693_s8, 128  ;;  %s888_s15 = scalar_lea.hbm %s1400_s5, 256 }
 0x308   : > { %p885_p2 = scmp.ne.s32.totalorder %s693_s8, %s884_s11  ;;  %p889_p7 = scmp.lt.s32.totalorder %s693_s8, %s1400_s5 }
 0x309   : > { %p890_p0 = scmp.lt.s32.totalorder %s888_s15, %s884_s11 }
 0x30a   : > { %p886_p4 = pnand %p885_p2, %p1435_p12 }
 0x30b   : > { %p891_p6 = por %p890_p0, %p889_p7 }
 0x30c   : > { %p887_p9 = pneg %p886_p4 }
 0x30e   : > { %p892_p11 = pnand %p891_p6, %p887_p9 }
 0x310   : > { %895 = shalt.err (!%p892_p11)
}
 0x311   : > { %787 = dma.vmem_to_hbm [thread:$0]  (%p1435_p12), %s696_s25, 128, %s693_s8, %s681_s7  }
 0x312 PF: > { %s707_s29 = sand.u32 1, %s922_s18   ;;  %p1436_p13 = scmp.ne.s32.totalorder %s1410_s6, 0 }
 0x313   : > { %p1437_p1 = scmp.ge.s32.totalorder %s934_s21, 2  ;;  %s708_s16 = scalar_lea.sflag [#allocation5], %s707_s29 }
 0x315   : > { %p794_p3 = pnand %p1437_p1, %p1436_p13 }
 0x317   : > { %p795_p5 = pneg %p794_p3 }
 0x319   : > { %917 = dma.done.wait (%p795_p5), %s708_s16, 128  }
 0x31a   : > { %919 = vsyncadd (%p795_p5), %s708_s16, 4294967168  ;;  %p18_p8 = scmp.ge.s32.totalorder %s1002_s24, 4   ;;  %s1438_s18 = smov %s926_s19 }
 0x31b   : > { %s1439_s19 = smov %s930_s20  ;;  %s1440_s20 = smov %s1014_s27 }
 0x31c   : > { %s1441_s21 = smov %s1002_s24  ;;  %20 = sbr.rel (!%p18_p8) target bundleno = 5 (0x5), region = 85 }
 0x321   :  { %713 = vsyncpa [#allocation4], 1 }
 0x322   :  { %715 = vsyncpa [#allocation4 + $0x1], 1 }
 0x323   :  { %716 = vsyncpa [#allocation5], 1 }
 0x324   :  { %718 = vsyncpa [#allocation5 + $0x1], 1 }

</bundles_post_ra>
